<compile_context>
chip_gen: v7x
topology: tpu7x:2x2x1
jax: 0.10.0
libtpu: 0.0.40
codegen_flags: <defaults>
</compile_context>

<pallas_src>
import collections
import functools

import jax
import jax.numpy as jnp
from jax.experimental import pallas as pl
from jax.experimental.pallas import tpu as pltpu


def _round_up(x, m):
    return ((x + m - 1) // m) * m


def _default_vmem_limit_bytes():
    """Generation-gated scoped-VMEM limit: ~3/4 of physical VMEM."""
    cap = 64 * 1024 * 1024  # conservative default (v7x per-TC VMEM)
    try:
        c = int(pltpu.get_tpu_info().vmem_capacity_bytes)
        if c > 0:
            cap = c
    except Exception:
        pass
    return min(cap * 3 // 4, 100 * 1024 * 1024)


def _largest_aligned_divisor(dim, align, cap):
    """Largest multiple of `align` that divides `dim` and is <= cap."""
    best = align
    t = align
    limit = min(cap, dim)
    while t <= limit:
        if dim % t == 0:
            best = t
        t += align
    return best


def _select_tiles(Kp, Np, itemsize, weight_budget_bytes, full_k):
    """Pick (tk, tn) that exactly divide (Kp, Np) and fit the VMEM budget."""
    if full_k:
        # Small K (< 128): one full-K block per step, no K padding at all.
        tn_cap = max(128, weight_budget_bytes // (2 * Kp * itemsize))
        tn = _largest_aligned_divisor(Np, 128, min(tn_cap, 3328))
        return Kp, tn
    # Prefer tn=1664-class tiles (even N-block counts for megacore) when a
    # 3328-deep K tile still fits double-buffered; else fall back to 1024.
    tn_target = 1664 if 2 * 3328 * 1664 * itemsize <= weight_budget_bytes else 1024
    tn = _largest_aligned_divisor(Np, 128, tn_target)
    tk_cap = max(128, weight_budget_bytes // (2 * tn * itemsize))
    tk = _largest_aligned_divisor(Kp, 128, min(tk_cap, 3328))
    return tk, tn


def _linear_kernel(x_ref, w_ref, b_ref, o_ref, acc_ref, *, tk, apply_relu):
    """One (Mp, tn) output tile; the K reduction runs along grid axis 1.

    x_ref holds the FULL (Mp, Kp) activation block (resident in VMEM);
    the current K chunk is sliced in-kernel.
    """
    k = pl.program_id(1)

    @pl.when(k == 0)
    def _():
        acc_ref[...] = jnp.zeros_like(acc_ref)

    if tk == x_ref.shape[-1]:
        x_blk = x_ref[...]                       # single K step: static read
    else:
        k_start = pl.multiple_of(k * tk, 128)    # tk is a multiple of 128 here
        x_blk = x_ref[:, pl.ds(k_start, tk)]
    w_blk = w_ref[...]
    if x_blk.dtype != w_blk.dtype:               # bf16 weights: feed MXU in bf16
        x_blk = x_blk.astype(w_blk.dtype)
    acc_ref[...] += jnp.dot(x_blk, w_blk, preferred_element_type=jnp.float32)

    @pl.when(k == pl.num_programs(1) - 1)
    def _():
        y = acc_ref[...] + b_ref[...]            # bias kept in f32
        if apply_relu:
            y = jnp.maximum(y, 0.0)
        o_ref[...] = y.astype(o_ref.dtype)


def _pallas_linear(x, w_p, b_p, meta, vmem_limit_bytes):
    """y = x @ W + b (optional ReLU) with pre-padded weights/bias.

    x: (M, K) unpadded activations; w_p: (Kp, Np); b_p: (1, Np) f32.
    Returns (M, N), slicing off padded rows/cols.
    """
    M, K = x.shape
    assert K == meta.K
    Kp, Np, tk, tn = meta.Kp, meta.Np, meta.tk, meta.tn
    Mp = _round_up(M, 8)                         # batch padded to f32 sublanes
    x_p = x if (Mp == M and Kp == K) else jnp.pad(x, ((0, Mp - M), (0, Kp - K)))

    grid = (Np // tn, Kp // tk)                  # reduction axis (K) last
    kernel = functools.partial(_linear_kernel, tk=tk, apply_relu=meta.relu)

    w_bytes = w_p.size * w_p.dtype.itemsize
    cost = pl.CostEstimate(
        flops=2 * Mp * Kp * Np,
        transcendentals=0,
        bytes_accessed=(x_p.size * x_p.dtype.itemsize + w_bytes
                        + b_p.size * 4 + Mp * Np * x.dtype.itemsize),
    )

    out_p = pl.pallas_call(
        kernel,
        out_shape=jax.ShapeDtypeStruct((Mp, Np), x.dtype),
        grid_spec=pltpu.PrefetchScalarGridSpec(
            num_scalar_prefetch=0,
            grid=grid,
            in_specs=[
                # Activations: whole padded block, resident across the grid.
                pl.BlockSpec((Mp, Kp), lambda j, k: (0, 0)),
                # Weights: streamed (tk, tn) tiles -- the HBM-bound stream.
                pl.BlockSpec((tk, tn), lambda j, k: (k, j)),
                # Bias: one lane-dense row per N tile.
                pl.BlockSpec((1, tn), lambda j, k: (0, j)),
            ],
            out_specs=pl.BlockSpec((Mp, tn), lambda j, k: (0, j)),
            scratch_shapes=[pltpu.VMEM((Mp, tn), jnp.float32)],
        ),
        compiler_params=pltpu.CompilerParams(
            dimension_semantics=("parallel", "arbitrary"),
            vmem_limit_bytes=vmem_limit_bytes,
        ),
        cost_estimate=cost,
    )(x_p, w_p, b_p)

    return out_p[:M, :meta.N]


LayerMeta = collections.namedtuple("LayerMeta", "K N Kp Np tk tn relu")

_LAYER_ORDER = ("layer1", "layer2", "layer3")
_LAYER_RELU = {"layer1": True, "layer2": True, "layer3": False}


def init_dqn_params(key, n_observations, hidden, n_actions):
    """PyTorch nn.Linear default init: U(-1/sqrt(fan_in), 1/sqrt(fan_in)).

    Weights are stored transposed, (in_features, out_features), in f32.
    """
    def linear_init(k, fan_in, fan_out):
        kw, kb = jax.random.split(k)
        bound = 1.0 / jnp.sqrt(float(fan_in))
        w = jax.random.uniform(kw, (fan_in, fan_out), jnp.float32, -bound, bound)
        b = jax.random.uniform(kb, (fan_out,), jnp.float32, -bound, bound)
        return w, b

    k1, k2, k3 = jax.random.split(key, 3)
    return {
        "layer1": linear_init(k1, n_observations, hidden),
        "layer2": linear_init(k2, hidden, hidden),
        "layer3": linear_init(k3, hidden, n_actions),
    }


def prepare_dqn_params(raw_params, dtype=jnp.bfloat16, vmem_limit_bytes=None):
    """One-time weight prep: pad K/N to tile multiples, cast weights to `dtype`.

    Returns (params, metas, vmem_limit_bytes); `params` contains only arrays
    (jit-able pytree), `metas` only static Python ints/bools.
    """
    if vmem_limit_bytes is None:
        vmem_limit_bytes = _default_vmem_limit_bytes()
    # Reserve headroom for the resident x block, out / acc / bias buffers.
    weight_budget = max(8 * 1024 * 1024, vmem_limit_bytes - 8 * 1024 * 1024)
    itemsize = jnp.dtype(dtype).itemsize

    params, metas = {}, {}
    for name in _LAYER_ORDER:
        w, b = raw_params[name]
        K, N = w.shape
        full_k = K < 128
        Kp = K if full_k else _round_up(K, 128)          # no K pad for small K
        Np = _round_up(N, 128)                           # lane-dense outputs
        tk, tn = _select_tiles(Kp, Np, itemsize, weight_budget, full_k)
        w_p = w if (Kp == K and Np == N) else jnp.pad(w, ((0, Kp - K), (0, Np - N)))
        b_p = b if Np == N else jnp.pad(b, (0, Np - N))
        params[name] = {
            "w": w_p.astype(dtype),
            "b": b_p.astype(jnp.float32).reshape(1, Np),
        }
        metas[name] = LayerMeta(K, N, Kp, Np, tk, tn, _LAYER_RELU[name])
    return params, metas, vmem_limit_bytes


def build_dqn_forward(metas, vmem_limit_bytes):
    """Returns a jitted forward(params, x) -> (batch, n_actions)."""
    def fwd(params, x):
        for name in _LAYER_ORDER:
            x = _pallas_linear(x, params[name]["w"], params[name]["b"],
                               metas[name], vmem_limit_bytes)
        return x
    return jax.jit(fwd)


def dqn_forward_ref(raw_params, x, compute_dtype=jnp.float32):
    """Pure-JAX reference with the same dtype policy (f32 accumulation)."""
    def lin(x, w, b, relu):
        y = jnp.dot(x.astype(compute_dtype), w.astype(compute_dtype),
                    preferred_element_type=jnp.float32) + b.astype(jnp.float32)
        return jnp.maximum(y, 0.0) if relu else y

    w1, b1 = raw_params["layer1"]
    w2, b2 = raw_params["layer2"]
    w3, b3 = raw_params["layer3"]
    x = lin(x, w1, b1, True)
    x = lin(x, w2, b2, True)
    return lin(x, w3, b3, False)


if __name__ == "__main__":
    # Small shapes consistent with the module's structure.
    # (Real module: hidden = 129 * 100 = 12900 -> pads to 13312 = 13*1024,
    #  giving tk=3328 / tn=1024-1664 tiles; same code path.)
    batch = 2
    n_observations = 32
    hidden = 256
    n_actions = 8

    key = jax.random.PRNGKey(0)
    k_params, k_x = jax.random.split(key)
    raw = init_dqn_params(k_params, n_observations, hidden, n_actions)
    x = jax.random.normal(k_x, (batch, n_observations), jnp.float32)

    # --- f32 weights: bit-compatible with the PyTorch f32 forward. ---
    params32, metas32, vmem32 = prepare_dqn_params(raw, dtype=jnp.float32)
    fwd32 = build_dqn_forward(metas32, vmem32)
    out32 = jax.block_until_ready(fwd32(params32, x))
    ref32 = jax.block_until_ready(dqn_forward_ref(raw, x, jnp.float32))
    assert out32.shape == (batch, n_actions)
    assert jnp.allclose(out32, ref32, atol=1e-4, rtol=1e-4)

    # --- bf16 weights: halves HBM weight traffic; checked vs a matched
    #     bf16-input / f32-accumulation reference. ---
    params16, metas16, vmem16 = prepare_dqn_params(raw, dtype=jnp.bfloat16)
    fwd16 = build_dqn_forward(metas16, vmem16)
    out16 = jax.block_until_ready(fwd16(params16, x))
    ref16 = jax.block_until_ready(dqn_forward_ref(raw, x, jnp.bfloat16))
    assert out16.shape == (batch, n_actions)
    assert jnp.allclose(out16, ref16, atol=2e-2, rtol=2e-2)

    print("KERNEL_OK")
</pallas_src>

<mosaic_0001>
module attributes {stable_mosaic.version = 11 : i64} {
  func.func @_linear_kernel(%arg0: i32, %arg1: i32, %arg2: memref<8x256xf32, #tpu.memory_space<vmem>>, %arg3: memref<256x256xf32, #tpu.memory_space<vmem>>, %arg4: memref<1x256xf32, #tpu.memory_space<vmem>>, %arg5: memref<8x256xf32, #tpu.memory_space<vmem>>, %arg6: memref<8x256xf32, #tpu.memory_space<vmem>>) attributes {dimension_semantics = [#tpu.dimension_semantics<parallel>, #tpu.dimension_semantics<arbitrary>], iteration_bounds = array<i64: 1, 1>, scalar_prefetch = 0 : i64, scratch_operands = 1 : i64, tpu.core_type = #tpu.core_type<tc>, window_params = [{pipeline_mode = #tpu.pipeline_mode<synchronous>, transform_indices = @transform_0, window_bounds = array<i64: 8, 256>}, {transform_indices = @transform_1, window_bounds = array<i64: 256, 256>}, {transform_indices = @transform_2, window_bounds = array<i64: 1, 256>}, {transform_indices = @transform_3, window_bounds = array<i64: 8, 256>}]} {
    %c0_i32 = arith.constant 0 : i32
    %0 = arith.cmpi eq, %arg1, %c0_i32 : i32
    %1 = arith.extui %0 : i1 to i32
    %c0_i32_0 = arith.constant 0 : i32
    %2 = arith.cmpi ne, %1, %c0_i32_0 : i32
    scf.if %2 {
      %cst_10 = arith.constant 0.000000e+00 : f32
      %12 = vector.broadcast %cst_10 : f32 to vector<8x256xf32>
      %c0_11 = arith.constant 0 : index
      %c0_12 = arith.constant 0 : index
      %13 = vector.load %arg6[%c0_11, %c0_12] : memref<8x256xf32, #tpu.memory_space<vmem>>, vector<8x256xf32>
      tpu.vector_store %arg6[%c0_11, %c0_12], %12 {strides = array<i32>} : memref<8x256xf32, #tpu.memory_space<vmem>>, vector<8x256xf32>,
    } else {
    }
    %c0 = arith.constant 0 : index
    %c0_1 = arith.constant 0 : index
    %3 = vector.load %arg2[%c0, %c0_1] : memref<8x256xf32, #tpu.memory_space<vmem>>, vector<8x256xf32>
    %c0_2 = arith.constant 0 : index
    %c0_3 = arith.constant 0 : index
    %4 = vector.load %arg3[%c0_2, %c0_3] : memref<256x256xf32, #tpu.memory_space<vmem>>, vector<256x256xf32>
    %c0_4 = arith.constant 0 : index
    %c0_5 = arith.constant 0 : index
    %5 = vector.load %arg6[%c0_4, %c0_5] : memref<8x256xf32, #tpu.memory_space<vmem>>, vector<8x256xf32>
    %cst = arith.constant dense<0.000000e+00> : vector<8x256xf32>
    %6 = tpu.matmul %3, %4, %cst {dimension_numbers = #tpu.dot_dimension_numbers<[1], [0], [0], [1], [0, 0, 1, 1], [], []>} : vector<8x256xf32>, vector<256x256xf32>, vector<8x256xf32> -> vector<8x256xf32>
    %7 = arith.addf %5, %6 : vector<8x256xf32>
    %c0_6 = arith.constant 0 : index
    %c0_7 = arith.constant 0 : index
    %8 = vector.load %arg6[%c0_6, %c0_7] : memref<8x256xf32, #tpu.memory_space<vmem>>, vector<8x256xf32>
    tpu.vector_store %arg6[%c0_6, %c0_7], %7 {strides = array<i32>} : memref<8x256xf32, #tpu.memory_space<vmem>>, vector<8x256xf32>,
    %c0_i32_8 = arith.constant 0 : i32
    %9 = arith.cmpi eq, %arg1, %c0_i32_8 : i32
    %10 = arith.extui %9 : i1 to i32
    %c0_i32_9 = arith.constant 0 : i32
    %11 = arith.cmpi ne, %10, %c0_i32_9 : i32
    scf.if %11 {
      %c0_10 = arith.constant 0 : index
      %c0_11 = arith.constant 0 : index
      %12 = vector.load %arg6[%c0_10, %c0_11] : memref<8x256xf32, #tpu.memory_space<vmem>>, vector<8x256xf32>
      %c0_12 = arith.constant 0 : index
      %c0_13 = arith.constant 0 : index
      %13 = vector.load %arg4[%c0_12, %c0_13] : memref<1x256xf32, #tpu.memory_space<vmem>>, vector<1x256xf32>
      %14 = vector.broadcast %13 : vector<1x256xf32> to vector<8x256xf32>
      %15 = arith.addf %12, %14 : vector<8x256xf32>
      %cst_14 = arith.constant 0.000000e+00 : f32
      %16 = vector.broadcast %cst_14 : f32 to vector<8x256xf32>
      %17 = arith.maximumf %15, %16 : vector<8x256xf32>
      %c0_15 = arith.constant 0 : index
      %c0_16 = arith.constant 0 : index
      %18 = vector.load %arg5[%c0_15, %c0_16] : memref<8x256xf32, #tpu.memory_space<vmem>>, vector<8x256xf32>
      tpu.vector_store %arg5[%c0_15, %c0_16], %17 {strides = array<i32>} : memref<8x256xf32, #tpu.memory_space<vmem>>, vector<8x256xf32>,
    } else {
    }
    return
  }
  func.func @transform_0(%arg0: i32, %arg1: i32) -> (i32, i32) {
    %c0_i32 = arith.constant 0 : i32
    %c0_i32_0 = arith.constant 0 : i32
    %c0_i32_1 = arith.constant 0 : i32
    return %c0_i32, %c0_i32_0 : i32, i32
  }
  func.func @transform_1(%arg0: i32, %arg1: i32) -> (i32, i32) {
    %c0_i32 = arith.constant 0 : i32
    return %arg1, %arg0 : i32, i32
  }
  func.func @transform_2(%arg0: i32, %arg1: i32) -> (i32, i32) {
    %c0_i32 = arith.constant 0 : i32
    %c0_i32_0 = arith.constant 0 : i32
    return %c0_i32, %arg0 : i32, i32
  }
  func.func @transform_3(%arg0: i32, %arg1: i32) -> (i32, i32) {
    %c0_i32 = arith.constant 0 : i32
    %c0_i32_0 = arith.constant 0 : i32
    return %c0_i32, %arg0 : i32, i32
  }
}

module attributes {stable_mosaic.version = 11 : i64} {
  func.func @_linear_kernel(%arg0: i32, %arg1: i32, %arg2: memref<8x32xf32, #tpu.memory_space<vmem>>, %arg3: memref<32x256xf32, #tpu.memory_space<vmem>>, %arg4: memref<1x256xf32, #tpu.memory_space<vmem>>, %arg5: memref<8x256xf32, #tpu.memory_space<vmem>>, %arg6: memref<8x256xf32, #tpu.memory_space<vmem>>) attributes {dimension_semantics = [#tpu.dimension_semantics<parallel>, #tpu.dimension_semantics<arbitrary>], iteration_bounds = array<i64: 1, 1>, scalar_prefetch = 0 : i64, scratch_operands = 1 : i64, tpu.core_type = #tpu.core_type<tc>, window_params = [{pipeline_mode = #tpu.pipeline_mode<synchronous>, transform_indices = @transform_0, window_bounds = array<i64: 8, 32>}, {transform_indices = @transform_1, window_bounds = array<i64: 32, 256>}, {transform_indices = @transform_2, window_bounds = array<i64: 1, 256>}, {transform_indices = @transform_3, window_bounds = array<i64: 8, 256>}]} {
    %c0_i32 = arith.constant 0 : i32
    %0 = arith.cmpi eq, %arg1, %c0_i32 : i32
    %1 = arith.extui %0 : i1 to i32
    %c0_i32_0 = arith.constant 0 : i32
    %2 = arith.cmpi ne, %1, %c0_i32_0 : i32
    scf.if %2 {
      %cst_10 = arith.constant 0.000000e+00 : f32
      %12 = vector.broadcast %cst_10 : f32 to vector<8x256xf32>
      %c0_11 = arith.constant 0 : index
      %c0_12 = arith.constant 0 : index
      %13 = vector.load %arg6[%c0_11, %c0_12] : memref<8x256xf32, #tpu.memory_space<vmem>>, vector<8x256xf32>
      tpu.vector_store %arg6[%c0_11, %c0_12], %12 {strides = array<i32>} : memref<8x256xf32, #tpu.memory_space<vmem>>, vector<8x256xf32>,
    } else {
    }
    %c0 = arith.constant 0 : index
    %c0_1 = arith.constant 0 : index
    %3 = vector.load %arg2[%c0, %c0_1] : memref<8x32xf32, #tpu.memory_space<vmem>>, vector<8x32xf32>
    %c0_2 = arith.constant 0 : index
    %c0_3 = arith.constant 0 : index
    %4 = vector.load %arg3[%c0_2, %c0_3] : memref<32x256xf32, #tpu.memory_space<vmem>>, vector<32x256xf32>
    %c0_4 = arith.constant 0 : index
    %c0_5 = arith.constant 0 : index
    %5 = vector.load %arg6[%c0_4, %c0_5] : memref<8x256xf32, #tpu.memory_space<vmem>>, vector<8x256xf32>
    %cst = arith.constant dense<0.000000e+00> : vector<8x256xf32>
    %6 = tpu.matmul %3, %4, %cst {dimension_numbers = #tpu.dot_dimension_numbers<[1], [0], [0], [1], [0, 0, 1, 1], [], []>} : vector<8x32xf32>, vector<32x256xf32>, vector<8x256xf32> -> vector<8x256xf32>
    %7 = arith.addf %5, %6 : vector<8x256xf32>
    %c0_6 = arith.constant 0 : index
    %c0_7 = arith.constant 0 : index
    %8 = vector.load %arg6[%c0_6, %c0_7] : memref<8x256xf32, #tpu.memory_space<vmem>>, vector<8x256xf32>
    tpu.vector_store %arg6[%c0_6, %c0_7], %7 {strides = array<i32>} : memref<8x256xf32, #tpu.memory_space<vmem>>, vector<8x256xf32>,
    %c0_i32_8 = arith.constant 0 : i32
    %9 = arith.cmpi eq, %arg1, %c0_i32_8 : i32
    %10 = arith.extui %9 : i1 to i32
    %c0_i32_9 = arith.constant 0 : i32
    %11 = arith.cmpi ne, %10, %c0_i32_9 : i32
    scf.if %11 {
      %c0_10 = arith.constant 0 : index
      %c0_11 = arith.constant 0 : index
      %12 = vector.load %arg6[%c0_10, %c0_11] : memref<8x256xf32, #tpu.memory_space<vmem>>, vector<8x256xf32>
      %c0_12 = arith.constant 0 : index
      %c0_13 = arith.constant 0 : index
      %13 = vector.load %arg4[%c0_12, %c0_13] : memref<1x256xf32, #tpu.memory_space<vmem>>, vector<1x256xf32>
      %14 = vector.broadcast %13 : vector<1x256xf32> to vector<8x256xf32>
      %15 = arith.addf %12, %14 : vector<8x256xf32>
      %cst_14 = arith.constant 0.000000e+00 : f32
      %16 = vector.broadcast %cst_14 : f32 to vector<8x256xf32>
      %17 = arith.maximumf %15, %16 : vector<8x256xf32>
      %c0_15 = arith.constant 0 : index
      %c0_16 = arith.constant 0 : index
      %18 = vector.load %arg5[%c0_15, %c0_16] : memref<8x256xf32, #tpu.memory_space<vmem>>, vector<8x256xf32>
      tpu.vector_store %arg5[%c0_15, %c0_16], %17 {strides = array<i32>} : memref<8x256xf32, #tpu.memory_space<vmem>>, vector<8x256xf32>,
    } else {
    }
    return
  }
  func.func @transform_0(%arg0: i32, %arg1: i32) -> (i32, i32) {
    %c0_i32 = arith.constant 0 : i32
    %c0_i32_0 = arith.constant 0 : i32
    %c0_i32_1 = arith.constant 0 : i32
    return %c0_i32, %c0_i32_0 : i32, i32
  }
  func.func @transform_1(%arg0: i32, %arg1: i32) -> (i32, i32) {
    %c0_i32 = arith.constant 0 : i32
    return %arg1, %arg0 : i32, i32
  }
  func.func @transform_2(%arg0: i32, %arg1: i32) -> (i32, i32) {
    %c0_i32 = arith.constant 0 : i32
    %c0_i32_0 = arith.constant 0 : i32
    return %c0_i32, %arg0 : i32, i32
  }
  func.func @transform_3(%arg0: i32, %arg1: i32) -> (i32, i32) {
    %c0_i32 = arith.constant 0 : i32
    %c0_i32_0 = arith.constant 0 : i32
    return %c0_i32, %arg0 : i32, i32
  }
}

module attributes {stable_mosaic.version = 11 : i64} {
  func.func @_linear_kernel(%arg0: i32, %arg1: i32, %arg2: memref<8x256xf32, #tpu.memory_space<vmem>>, %arg3: memref<256x128xf32, #tpu.memory_space<vmem>>, %arg4: memref<1x128xf32, #tpu.memory_space<vmem>>, %arg5: memref<8x128xf32, #tpu.memory_space<vmem>>, %arg6: memref<8x128xf32, #tpu.memory_space<vmem>>) attributes {dimension_semantics = [#tpu.dimension_semantics<parallel>, #tpu.dimension_semantics<arbitrary>], iteration_bounds = array<i64: 1, 1>, scalar_prefetch = 0 : i64, scratch_operands = 1 : i64, tpu.core_type = #tpu.core_type<tc>, window_params = [{pipeline_mode = #tpu.pipeline_mode<synchronous>, transform_indices = @transform_0, window_bounds = array<i64: 8, 256>}, {transform_indices = @transform_1, window_bounds = array<i64: 256, 128>}, {transform_indices = @transform_2, window_bounds = array<i64: 1, 128>}, {transform_indices = @transform_3, window_bounds = array<i64: 8, 128>}]} {
    %c0_i32 = arith.constant 0 : i32
    %0 = arith.cmpi eq, %arg1, %c0_i32 : i32
    %1 = arith.extui %0 : i1 to i32
    %c0_i32_0 = arith.constant 0 : i32
    %2 = arith.cmpi ne, %1, %c0_i32_0 : i32
    scf.if %2 {
      %cst_10 = arith.constant 0.000000e+00 : f32
      %12 = vector.broadcast %cst_10 : f32 to vector<8x128xf32>
      %c0_11 = arith.constant 0 : index
      %c0_12 = arith.constant 0 : index
      %13 = vector.load %arg6[%c0_11, %c0_12] : memref<8x128xf32, #tpu.memory_space<vmem>>, vector<8x128xf32>
      tpu.vector_store %arg6[%c0_11, %c0_12], %12 {strides = array<i32>} : memref<8x128xf32, #tpu.memory_space<vmem>>, vector<8x128xf32>,
    } else {
    }
    %c0 = arith.constant 0 : index
    %c0_1 = arith.constant 0 : index
    %3 = vector.load %arg2[%c0, %c0_1] : memref<8x256xf32, #tpu.memory_space<vmem>>, vector<8x256xf32>
    %c0_2 = arith.constant 0 : index
    %c0_3 = arith.constant 0 : index
    %4 = vector.load %arg3[%c0_2, %c0_3] : memref<256x128xf32, #tpu.memory_space<vmem>>, vector<256x128xf32>
    %c0_4 = arith.constant 0 : index
    %c0_5 = arith.constant 0 : index
    %5 = vector.load %arg6[%c0_4, %c0_5] : memref<8x128xf32, #tpu.memory_space<vmem>>, vector<8x128xf32>
    %cst = arith.constant dense<0.000000e+00> : vector<8x128xf32>
    %6 = tpu.matmul %3, %4, %cst {dimension_numbers = #tpu.dot_dimension_numbers<[1], [0], [0], [1], [0, 0, 1, 1], [], []>} : vector<8x256xf32>, vector<256x128xf32>, vector<8x128xf32> -> vector<8x128xf32>
    %7 = arith.addf %5, %6 : vector<8x128xf32>
    %c0_6 = arith.constant 0 : index
    %c0_7 = arith.constant 0 : index
    %8 = vector.load %arg6[%c0_6, %c0_7] : memref<8x128xf32, #tpu.memory_space<vmem>>, vector<8x128xf32>
    tpu.vector_store %arg6[%c0_6, %c0_7], %7 {strides = array<i32>} : memref<8x128xf32, #tpu.memory_space<vmem>>, vector<8x128xf32>,
    %c0_i32_8 = arith.constant 0 : i32
    %9 = arith.cmpi eq, %arg1, %c0_i32_8 : i32
    %10 = arith.extui %9 : i1 to i32
    %c0_i32_9 = arith.constant 0 : i32
    %11 = arith.cmpi ne, %10, %c0_i32_9 : i32
    scf.if %11 {
      %c0_10 = arith.constant 0 : index
      %c0_11 = arith.constant 0 : index
      %12 = vector.load %arg6[%c0_10, %c0_11] : memref<8x128xf32, #tpu.memory_space<vmem>>, vector<8x128xf32>
      %c0_12 = arith.constant 0 : index
      %c0_13 = arith.constant 0 : index
      %13 = vector.load %arg4[%c0_12, %c0_13] : memref<1x128xf32, #tpu.memory_space<vmem>>, vector<1x128xf32>
      %14 = vector.broadcast %13 : vector<1x128xf32> to vector<8x128xf32>
      %15 = arith.addf %12, %14 : vector<8x128xf32>
      %c0_14 = arith.constant 0 : index
      %c0_15 = arith.constant 0 : index
      %16 = vector.load %arg5[%c0_14, %c0_15] : memref<8x128xf32, #tpu.memory_space<vmem>>, vector<8x128xf32>
      tpu.vector_store %arg5[%c0_14, %c0_15], %15 {strides = array<i32>} : memref<8x128xf32, #tpu.memory_space<vmem>>, vector<8x128xf32>,
    } else {
    }
    return
  }
  func.func @transform_0(%arg0: i32, %arg1: i32) -> (i32, i32) {
    %c0_i32 = arith.constant 0 : i32
    %c0_i32_0 = arith.constant 0 : i32
    %c0_i32_1 = arith.constant 0 : i32
    return %c0_i32, %c0_i32_0 : i32, i32
  }
  func.func @transform_1(%arg0: i32, %arg1: i32) -> (i32, i32) {
    %c0_i32 = arith.constant 0 : i32
    return %arg1, %arg0 : i32, i32
  }
  func.func @transform_2(%arg0: i32, %arg1: i32) -> (i32, i32) {
    %c0_i32 = arith.constant 0 : i32
    %c0_i32_0 = arith.constant 0 : i32
    return %c0_i32, %arg0 : i32, i32
  }
  func.func @transform_3(%arg0: i32, %arg1: i32) -> (i32, i32) {
    %c0_i32 = arith.constant 0 : i32
    %c0_i32_0 = arith.constant 0 : i32
    return %c0_i32, %arg0 : i32, i32
  }
}

</mosaic_0001>

<bundles_post_ra>
// kernel: fwd.3
= control target key start
LH: loop header
LB: loop body
LE: loop exit
PB: predicated region body
PF: predicated region fallthrough
CT: control target
= control target key end

     0   :  { %8 = vsyncpa [#allocation4], 0  ;;  %s189_s12 = smov [#allocation3]   ;;  %s237_s0 = inlined_call_operand.vmem [shape: f32[8,32], index: 0, kind: input, shape index: {}]   ;;  %s238_s1 = inlined_call_operand.hbm [shape: f32[32,256], index: 1, kind: input, shape index: {}]   ;;  %s239_s2 = inlined_call_operand.vmem [shape: f32[1,256], index: 2, kind: input, shape index: {}]   ;;  %s240_s3 = inlined_call_operand.vmem [shape: f32[8,256], index: 3, kind: output, shape index: {}]  }
   0x1   :  { %s16_s13 = sshll.u32 %s189_s12, 4  ;;  %s165_s16 = scalar_lea.hbm %s238_s1, 1024  ;;  %s17_s13 = int_to_ptr.vmem [resolvable:$true] %s16_s13 }
   0x2   :  { %p166_p0 = scmp.ne.s32.totalorder %s238_s1, %s165_s16  ;;  %p169_p1 = scmp.lt.u32.totalorder %s165_s16, %s238_s1 }
   0x4   :  { %p171_p2 = pnand %p169_p1, %p166_p0 }
   0x6   :  { %174 = shalt.err (!%p171_p2)
}
   0x7   :  { %s175_s21 = scalar_lea.vmem %s17_s13, 1024  ;;  %p180_p4 = scmp.lt.s32.totalorder %s17_s13, %s17_s13 }
   0x8   :  { %p176_p3 = scmp.ne.s32.totalorder %s17_s13, %s175_s21  ;;  %p181_p5 = scmp.lt.s32.totalorder %s175_s21, %s175_s21 }
   0xa   :  { %p182_p6 = por %p181_p5, %p180_p4 }
   0xc   :  { %p183_p7 = pnand %p182_p6, %p176_p3 }
   0xe   :  { %186 = shalt.err (!%p183_p7)
}
   0xf   :  { %s190_s22 = smov 256   ;;  %s191_s23 = smov 16  }
  0x10   :  { %22 = dma.hbm_to_vmem [thread:$0]  %s238_s1, 1024, %s17_s13, [#allocation4], %s190_s22, %s190_s22, %s191_s23  }
  0x11   :  { %187 = dma.done.wait [#allocation4], 1024  }
  0x12   :  { %188 = vsyncadd [#allocation4], 4294966272  ;;  %v192_v0 = vmov 0.0   ;;  %v36_v1 = vld [vmem:[#allocation3 + $0x8] sm:$0xff]  ;;  %v38_v2 = vld [vmem:[#allocation3 + $0x18] sm:$0xff]  ;;  %vm45_vm0 = vcmask 261120   ;;  %v131_v14 = vlaneseq }
  0x13   :  { %113 = vmatprep.mubr.f32.mxu0 %v192_v0  ;;  %v35_v3 = vld [vmem:[#allocation3] sm:$0xff]  ;;  %v153_v4 = vpack.c.bf16 %v38_v2, %v36_v1  ;;  %v37_v5 = vld [vmem:[#allocation3 + $0x10] sm:$0xff]  ;;  %v40_v6 = vld [vmem:[#allocation3 + $0x28] sm:$0xff] }
  0x14   :  { %v42_v7 = vld [vmem:[#allocation3 + $0x38] sm:$0xff]  ;;  %v155_v8 = vpack.c.bf16 %v37_v5, %v35_v3  ;;  %v39_v10 = vld [vmem:[#allocation3 + $0x20] sm:$0xff]  ;;  %v41_v11 = vld [vmem:[#allocation3 + $0x30] sm:$0xff]  ;;  %v132_v15 = vshrl.u32 %v131_v14, 7 }
  0x15   :  { %v157_v9 = vpack.c.bf16 %v42_v7, %v40_v6  ;;  %154 = vmatprep.subr.bf16.mxu0 %v153_v4  ;;  %v159_v12 = vpack.c.bf16 %v41_v11, %v39_v10  ;;  %v34_v13 = vld [vmem:[%s237_s0] sm:$0xff] }
  0x16   :  { %156 = vmatpush1.bf16.msra.mxu0 %v155_v8  ;;  %v133_v16 = vsub.s32 0, %v132_v15  ;;  %v129_v17 = vld [vmem:[%s239_s2] sm:$0x3]  ;;  %v137_v18 = vsub.s32 1, %v132_v15 }
  0x17   :  { %158 = vmatprep.subr.bf16.mxu0 %v157_v9 }
  0x18   :  { %v134_v19 = vrot.slane %v129_v17, %v133_v16  ;;  %v138_v20 = vrot.slane %v129_v17, %v137_v18 }
  0x1a   :  { %160 = vmatpush1.bf16.msra.mxu0 %v159_v12 }
  0x1d   :  { %152 = vmatmul.mubr.msk.f32.vlgmr.msra.gmra.mrb[0].mxu0 %vm45_vm0, %v34_v13 }
  0xf0   :  { %v115_v21 = vpop.f32.mrb[0].mxu0 }
  0xf1   :  { %v141_v22 = vadd.f32 %v134_v19, %v115_v21  ;;  %v117_v23 = vpop.f32.mrb[1].mxu0 }
  0xf2   :  { %v142_v24 = vadd.f32 %v138_v20, %v117_v23 }
  0xf3   :  { %v143_v25 = vmax.f32 %v141_v22, 0.0 }
  0xf4   :  { %v144_v26 = vmax.f32 %v142_v24, 0.0 }
  0xf5   :  { %145 = vst [vmem:[%s240_s3] sm:$0xff] %v143_v25 }
  0xf6   :  { %146 = vst [vmem:[%s240_s3 + $0x8] sm:$0xff] %v144_v26 }
  0xf7   :  { %151 = vsyncpa [#allocation4], 1 }

// kernel: fwd.4
= control target key start
LH: loop header
LB: loop body
LE: loop exit
PB: predicated region body
PF: predicated region fallthrough
CT: control target
= control target key end

     0   :  { %8 = vsyncpa [#allocation4], 0  ;;  %s296_s12 = smov [#allocation3]   ;;  %s346_s0 = inlined_call_operand.vmem [shape: f32[8,256], index: 0, kind: input, shape index: {}]   ;;  %s347_s1 = inlined_call_operand.hbm [shape: f32[256,256], index: 1, kind: input, shape index: {}]   ;;  %s348_s2 = inlined_call_operand.vmem [shape: f32[1,256], index: 2, kind: input, shape index: {}]   ;;  %s349_s3 = inlined_call_operand.vmem [shape: f32[8,256], index: 3, kind: output, shape index: {}]  }
   0x1   :  { %s16_s13 = sshll.u32 %s296_s12, 4  ;;  %s272_s16 = scalar_lea.hbm %s347_s1, 8192  ;;  %s17_s13 = int_to_ptr.vmem [resolvable:$true] %s16_s13 }
   0x2   :  { %p273_p0 = scmp.ne.s32.totalorder %s347_s1, %s272_s16  ;;  %p276_p1 = scmp.lt.u32.totalorder %s272_s16, %s347_s1 }
   0x4   :  { %p278_p2 = pnand %p276_p1, %p273_p0 }
   0x6   :  { %281 = shalt.err (!%p278_p2)
}
   0x7   :  { %s282_s21 = scalar_lea.vmem %s17_s13, 8192  ;;  %p287_p4 = scmp.lt.s32.totalorder %s17_s13, %s17_s13 }
   0x8   :  { %p283_p3 = scmp.ne.s32.totalorder %s17_s13, %s282_s21  ;;  %p288_p5 = scmp.lt.s32.totalorder %s282_s21, %s282_s21 }
   0xa   :  { %p289_p6 = por %p288_p5, %p287_p4 }
   0xc   :  { %p290_p7 = pnand %p289_p6, %p283_p3 }
   0xe   :  { %293 = shalt.err (!%p290_p7)
}
   0xf   :  { %s297_s22 = smov 256   ;;  %s298_s23 = smov 16  }
  0x10   :  { %22 = dma.hbm_to_vmem [thread:$0]  %s347_s1, 8192, %s17_s13, [#allocation4], %s297_s22, %s297_s22, %s298_s23  }
  0x11   :  { %294 = dma.done.wait [#allocation4], 8192  }
  0x12   :  { %295 = vsyncadd [#allocation4], 4294959104  ;;  %v37_v0 = vld [vmem:[#allocation3 + $0x8] sm:$0xff]  ;;  %v39_v1 = vld [vmem:[#allocation3 + $0x18] sm:$0xff] }
  0x13   :  { %v36_v2 = vld [vmem:[#allocation3] sm:$0xff]  ;;  %v205_v3 = vpack.c.bf16 %v39_v1, %v37_v0  ;;  %v38_v4 = vld [vmem:[#allocation3 + $0x10] sm:$0xff]  ;;  %v41_v5 = vld [vmem:[#allocation3 + $0x28] sm:$0xff] }
  0x14   :  { %v43_v6 = vld [vmem:[#allocation3 + $0x38] sm:$0xff]  ;;  %v207_v7 = vpack.c.bf16 %v38_v4, %v36_v2  ;;  %v40_v9 = vld [vmem:[#allocation3 + $0x20] sm:$0xff]  ;;  %v42_v10 = vld [vmem:[#allocation3 + $0x30] sm:$0xff] }
  0x15   :  { %v209_v8 = vpack.c.bf16 %v43_v6, %v41_v5  ;;  %v45_v11 = vld [vmem:[#allocation3 + $0x48] sm:$0xff]  ;;  %206 = vmatprep.subr.bf16.mxu0 %v205_v3  ;;  %v47_v12 = vld [vmem:[#allocation3 + $0x58] sm:$0xff]  ;;  %v211_v13 = vpack.c.bf16 %v42_v10, %v40_v9  ;;  %v44_v15 = vld [vmem:[#allocation3 + $0x40] sm:$0xff] }
  0x16   :  { %208 = vmatpush1.bf16.msra.mxu0 %v207_v7  ;;  %v213_v14 = vpack.c.bf16 %v47_v12, %v45_v11  ;;  %v46_v16 = vld [vmem:[#allocation3 + $0x50] sm:$0xff]  ;;  %v49_v17 = vld [vmem:[#allocation3 + $0x68] sm:$0xff]  ;;  %v51_v18 = vld [vmem:[#allocation3 + $0x78] sm:$0xff] }
  0x17   :  { %210 = vmatprep.subr.bf16.mxu0 %v209_v8  ;;  %v215_v19 = vpack.c.bf16 %v46_v16, %v44_v15  ;;  %v217_v20 = vpack.c.bf16 %v51_v18, %v49_v17  ;;  %v48_v21 = vld [vmem:[#allocation3 + $0x60] sm:$0xff]  ;;  %v50_v22 = vld [vmem:[#allocation3 + $0x70] sm:$0xff]  ;;  %v53_v23 = vld [vmem:[#allocation3 + $0x88] sm:$0xff] }
  0x18   :  { %v55_v24 = vld [vmem:[#allocation3 + $0x98] sm:$0xff]  ;;  %v219_v25 = vpack.c.bf16 %v50_v22, %v48_v21  ;;  %v52_v27 = vld [vmem:[#allocation3 + $0x80] sm:$0xff]  ;;  %v54_v28 = vld [vmem:[#allocation3 + $0x90] sm:$0xff] }
  0x19   :  { %v221_v26 = vpack.c.bf16 %v55_v24, %v53_v23  ;;  %v57_v29 = vld [vmem:[#allocation3 + $0xa8] sm:$0xff]  ;;  %v59_v30 = vld [vmem:[#allocation3 + $0xb8] sm:$0xff]  ;;  %v223_v31 = vpack.c.bf16 %v54_v28, %v52_v27  ;;  %v56_v33 = vld [vmem:[#allocation3 + $0xa0] sm:$0xff] }
  0x1a   :  { %212 = vmatpush1.bf16.msra.mxu0 %v211_v13  ;;  %v225_v32 = vpack.c.bf16 %v59_v30, %v57_v29  ;;  %v58_v34 = vld [vmem:[#allocation3 + $0xb0] sm:$0xff]  ;;  %v61_v35 = vld [vmem:[#allocation3 + $0xc8] sm:$0xff]  ;;  %v63_v36 = vld [vmem:[#allocation3 + $0xd8] sm:$0xff] }
  0x1b   :  { %214 = vmatprep.subr.bf16.mxu0 %v213_v14  ;;  %v227_v37 = vpack.c.bf16 %v58_v34, %v56_v33  ;;  %v229_v38 = vpack.c.bf16 %v63_v36, %v61_v35  ;;  %v60_v39 = vld [vmem:[#allocation3 + $0xc0] sm:$0xff]  ;;  %v62_v40 = vld [vmem:[#allocation3 + $0xd0] sm:$0xff]  ;;  %v35_v41 = vld [vmem:[%s346_s0 + $0x8] sm:$0xff]  ;;  %v184_v34 = vlaneseq }
  0x1c   :  { %v65_v42 = vld [vmem:[#allocation3 + $0xe8] sm:$0xff]  ;;  %v67_v43 = vld [vmem:[#allocation3 + $0xf8] sm:$0xff]  ;;  %166 = vmatprep.mubr.f32.mxu0 %v35_v41  ;;  %v231_v44 = vpack.c.bf16 %v62_v40, %v60_v39  ;;  %v64_v46 = vld [vmem:[#allocation3 + $0xe0] sm:$0xff] }
  0x1d   :  { %v233_v45 = vpack.c.bf16 %v67_v43, %v65_v42  ;;  %v66_v47 = vld [vmem:[#allocation3 + $0xf0] sm:$0xff]  ;;  %v69_v48 = vld [vmem:[#allocation3 + $0x108] sm:$0xff]  ;;  %v71_v49 = vld [vmem:[#allocation3 + $0x118] sm:$0xff]  ;;  %v185_v35 = vshrl.u32 %v184_v34, 7 }
  0x1e   :  { %216 = vmatpush1.bf16.msra.mxu0 %v215_v19  ;;  %v235_v50 = vpack.c.bf16 %v66_v47, %v64_v46  ;;  %v237_v51 = vpack.c.bf16 %v71_v49, %v69_v48  ;;  %v68_v52 = vld [vmem:[#allocation3 + $0x100] sm:$0xff]  ;;  %v70_v53 = vld [vmem:[#allocation3 + $0x110] sm:$0xff]  ;;  %v73_v54 = vld [vmem:[#allocation3 + $0x128] sm:$0xff] }
  0x1f   :  { %218 = vmatprep.subr.bf16.mxu0 %v217_v20  ;;  %v75_v55 = vld [vmem:[#allocation3 + $0x138] sm:$0xff]  ;;  %v239_v56 = vpack.c.bf16 %v70_v53, %v68_v52  ;;  %v72_v58 = vld [vmem:[#allocation3 + $0x120] sm:$0xff]  ;;  %v74_v59 = vld [vmem:[#allocation3 + $0x130] sm:$0xff]  ;;  %v186_v36 = vsub.s32 0, %v185_v35 }
  0x20   :  { %v241_v57 = vpack.c.bf16 %v75_v55, %v73_v54  ;;  %v77_v60 = vld [vmem:[#allocation3 + $0x148] sm:$0xff]  ;;  %v79_v61 = vld [vmem:[#allocation3 + $0x158] sm:$0xff]  ;;  %v243_v62 = vpack.c.bf16 %v74_v59, %v72_v58  ;;  %v76_v0 = vld [vmem:[#allocation3 + $0x140] sm:$0xff] }
  0x21   :  { %v245_v63 = vpack.c.bf16 %v79_v61, %v77_v60  ;;  %v78_v1 = vld [vmem:[#allocation3 + $0x150] sm:$0xff]  ;;  %v81_v2 = vld [vmem:[#allocation3 + $0x168] sm:$0xff]  ;;  %v83_v3 = vld [vmem:[#allocation3 + $0x178] sm:$0xff] }
  0x22   :  { %220 = vmatpush1.bf16.msra.mxu0 %v219_v25  ;;  %v247_v4 = vpack.c.bf16 %v78_v1, %v76_v0  ;;  %v249_v5 = vpack.c.bf16 %v83_v3, %v81_v2  ;;  %v80_v6 = vld [vmem:[#allocation3 + $0x160] sm:$0xff]  ;;  %v82_v7 = vld [vmem:[#allocation3 + $0x170] sm:$0xff]  ;;  %v85_v8 = vld [vmem:[#allocation3 + $0x188] sm:$0xff] }
  0x23   :  { %222 = vmatprep.subr.bf16.mxu0 %v221_v26  ;;  %v87_v9 = vld [vmem:[#allocation3 + $0x198] sm:$0xff]  ;;  %v251_v10 = vpack.c.bf16 %v82_v7, %v80_v6  ;;  %v84_v12 = vld [vmem:[#allocation3 + $0x180] sm:$0xff]  ;;  %v86_v13 = vld [vmem:[#allocation3 + $0x190] sm:$0xff] }
  0x24   :  { %v253_v11 = vpack.c.bf16 %v87_v9, %v85_v8  ;;  %v89_v14 = vld [vmem:[#allocation3 + $0x1a8] sm:$0xff]  ;;  %v91_v15 = vld [vmem:[#allocation3 + $0x1b8] sm:$0xff]  ;;  %v255_v16 = vpack.c.bf16 %v86_v13, %v84_v12  ;;  %v88_v18 = vld [vmem:[#allocation3 + $0x1a0] sm:$0xff] }
  0x25   :  { %v257_v17 = vpack.c.bf16 %v91_v15, %v89_v14  ;;  %v90_v19 = vld [vmem:[#allocation3 + $0x1b0] sm:$0xff]  ;;  %v93_v20 = vld [vmem:[#allocation3 + $0x1c8] sm:$0xff]  ;;  %v95_v21 = vld [vmem:[#allocation3 + $0x1d8] sm:$0xff] }
  0x26   :  { %224 = vmatpush1.bf16.msra.mxu0 %v223_v31  ;;  %v259_v22 = vpack.c.bf16 %v90_v19, %v88_v18  ;;  %v261_v23 = vpack.c.bf16 %v95_v21, %v93_v20  ;;  %v92_v24 = vld [vmem:[#allocation3 + $0x1c0] sm:$0xff]  ;;  %v94_v25 = vld [vmem:[#allocation3 + $0x1d0] sm:$0xff]  ;;  %v97_v26 = vld [vmem:[#allocation3 + $0x1e8] sm:$0xff] }
  0x27   :  { %226 = vmatprep.subr.bf16.mxu0 %v225_v32  ;;  %v99_v27 = vld [vmem:[#allocation3 + $0x1f8] sm:$0xff]  ;;  %v263_v28 = vpack.c.bf16 %v94_v25, %v92_v24  ;;  %v96_v30 = vld [vmem:[#allocation3 + $0x1e0] sm:$0xff]  ;;  %v98_v31 = vld [vmem:[#allocation3 + $0x1f0] sm:$0xff] }
  0x28   :  { %v265_v29 = vpack.c.bf16 %v99_v27, %v97_v26  ;;  %v267_v32 = vpack.c.bf16 %v98_v31, %v96_v30  ;;  %v34_v33 = vld [vmem:[%s346_s0] sm:$0xff] }
  0x2a   :  { %228 = vmatpush1.bf16.msra.mxu0 %v227_v37  ;;  %v182_v37 = vld [vmem:[%s348_s2] sm:$0x3] }
  0x2b   :  { %230 = vmatprep.subr.bf16.mxu0 %v229_v38  ;;  %v190_v38 = vsub.s32 1, %v185_v35  ;;  %v187_v39 = vrot.slane %v182_v37, %v186_v36 }
  0x2d   :  { %v191_v40 = vrot.slane %v182_v37, %v190_v38 }
  0x2e   :  { %232 = vmatpush1.bf16.msra.mxu0 %v231_v44 }
  0x2f   :  { %234 = vmatprep.subr.bf16.mxu0 %v233_v45 }
  0x32   :  { %236 = vmatpush1.bf16.msra.mxu0 %v235_v50 }
  0x33   :  { %238 = vmatprep.subr.bf16.mxu0 %v237_v51 }
  0x36   :  { %240 = vmatpush1.bf16.msra.mxu0 %v239_v56 }
  0x37   :  { %242 = vmatprep.subr.bf16.mxu0 %v241_v57 }
  0x3a   :  { %244 = vmatpush1.bf16.msra.mxu0 %v243_v62 }
  0x3b   :  { %246 = vmatprep.subr.bf16.mxu0 %v245_v63 }
  0x3e   :  { %248 = vmatpush1.bf16.msra.mxu0 %v247_v4 }
  0x3f   :  { %250 = vmatprep.subr.bf16.mxu0 %v249_v5 }
  0x42   :  { %252 = vmatpush1.bf16.msra.mxu0 %v251_v10 }
  0x43   :  { %254 = vmatprep.subr.bf16.mxu0 %v253_v11 }
  0x46   :  { %256 = vmatpush1.bf16.msra.mxu0 %v255_v16 }
  0x47   :  { %258 = vmatprep.subr.bf16.mxu0 %v257_v17 }
  0x4a   :  { %260 = vmatpush1.bf16.msra.mxu0 %v259_v22 }
  0x4b   :  { %262 = vmatprep.subr.bf16.mxu0 %v261_v23 }
  0x4e   :  { %264 = vmatpush1.bf16.msra.mxu0 %v263_v28 }
  0x4f   :  { %266 = vmatprep.subr.bf16.mxu0 %v265_v29 }
  0x52   :  { %268 = vmatpush1.bf16.msra.mxu0 %v267_v32 }
  0x55   :  { %167 = vmatmul.mubr.f32.vlgmr.msra.gmra.mrb[0].mxu0 %v34_v33 }
 0x128   :  { %v168_v41 = vpop.f32.mrb[0].mxu0 }
 0x129   :  { %v194_v42 = vadd.f32 %v187_v39, %v168_v41  ;;  %v170_v43 = vpop.f32.mrb[1].mxu0 }
 0x12a   :  { %v195_v44 = vadd.f32 %v191_v40, %v170_v43 }
 0x12b   :  { %v196_v45 = vmax.f32 %v194_v42, 0.0 }
 0x12c   :  { %v197_v46 = vmax.f32 %v195_v44, 0.0 }
 0x12d   :  { %198 = vst [vmem:[%s349_s3] sm:$0xff] %v196_v45 }
 0x12e   :  { %199 = vst [vmem:[%s349_s3 + $0x8] sm:$0xff] %v197_v46 }
 0x12f   :  { %204 = vsyncpa [#allocation4], 1 }

// kernel: fwd.5
= control target key start
LH: loop header
LB: loop body
LE: loop exit
PB: predicated region body
PF: predicated region fallthrough
CT: control target
= control target key end

     0   :  { %s339_s1 = inlined_call_operand.vmem [shape: f32[256,128], index: 1, kind: input, shape index: {}]   ;;  %s340_s0 = inlined_call_operand.vmem [shape: f32[8,256], index: 0, kind: input, shape index: {}]   ;;  %s341_s2 = inlined_call_operand.vmem [shape: f32[1,128], index: 2, kind: input, shape index: {}]   ;;  %s342_s3 = inlined_call_operand.vmem [shape: f32[8,128], index: 3, kind: output, shape index: {}]  }
   0x1   :  { %v37_v0 = vld [vmem:[%s339_s1 + $0x80] sm:$0xff]  ;;  %v38_v1 = vld [vmem:[%s339_s1 + $0x88] sm:$0xff]  ;;  %v39_v5 = vld [vmem:[%s339_s1 + $0x90] sm:$0xff] }
   0x2   :  { %v21_v2 = vld [vmem:[%s339_s1] sm:$0xff]  ;;  %v179_v3 = vpack.c.bf16 %v38_v1, %v37_v0  ;;  %v22_v4 = vld [vmem:[%s339_s1 + $0x8] sm:$0xff]  ;;  %v40_v6 = vld [vmem:[%s339_s1 + $0x98] sm:$0xff] }
   0x3   :  { %v181_v7 = vpack.c.bf16 %v22_v4, %v21_v2  ;;  %v183_v8 = vpack.c.bf16 %v40_v6, %v39_v5  ;;  %v23_v9 = vld [vmem:[%s339_s1 + $0x10] sm:$0xff]  ;;  %v24_v10 = vld [vmem:[%s339_s1 + $0x18] sm:$0xff]  ;;  %v41_v11 = vld [vmem:[%s339_s1 + $0xa0] sm:$0xff] }
   0x4   :  { %180 = vmatprep.subr.bf16.mxu0 %v179_v3  ;;  %v42_v12 = vld [vmem:[%s339_s1 + $0xa8] sm:$0xff]  ;;  %v185_v13 = vpack.c.bf16 %v24_v10, %v23_v9  ;;  %v25_v15 = vld [vmem:[%s339_s1 + $0x20] sm:$0xff]  ;;  %v43_v17 = vld [vmem:[%s339_s1 + $0xb0] sm:$0xff] }
   0x5   :  { %182 = vmatpush3.bf16.msra.mxu0 %v181_v7  ;;  %v187_v14 = vpack.c.bf16 %v42_v12, %v41_v11  ;;  %v26_v16 = vld [vmem:[%s339_s1 + $0x28] sm:$0xff]  ;;  %v44_v18 = vld [vmem:[%s339_s1 + $0xb8] sm:$0xff]  ;;  %v27_v21 = vld [vmem:[%s339_s1 + $0x30] sm:$0xff] }
   0x6   :  { %184 = vmatprep.subr.bf16.mxu0 %v183_v8  ;;  %v189_v19 = vpack.c.bf16 %v26_v16, %v25_v15  ;;  %v191_v20 = vpack.c.bf16 %v44_v18, %v43_v17  ;;  %v28_v22 = vld [vmem:[%s339_s1 + $0x38] sm:$0xff]  ;;  %v45_v23 = vld [vmem:[%s339_s1 + $0xc0] sm:$0xff]  ;;  %v46_v24 = vld [vmem:[%s339_s1 + $0xc8] sm:$0xff] }
   0x7   :  { %v20_v25 = vld [vmem:[%s340_s0 + $0x8] sm:$0xff]  ;;  %v193_v26 = vpack.c.bf16 %v28_v22, %v27_v21  ;;  %v195_v27 = vpack.c.bf16 %v46_v24, %v45_v23  ;;  %v29_v28 = vld [vmem:[%s339_s1 + $0x40] sm:$0xff]  ;;  %v47_v30 = vld [vmem:[%s339_s1 + $0xd0] sm:$0xff] }
   0x8   :  { %118 = vmatprep.mubr.f32.mxu0 %v20_v25  ;;  %v30_v29 = vld [vmem:[%s339_s1 + $0x48] sm:$0xff]  ;;  %v48_v31 = vld [vmem:[%s339_s1 + $0xd8] sm:$0xff]  ;;  %v31_v34 = vld [vmem:[%s339_s1 + $0x50] sm:$0xff] }
   0x9   :  { %186 = vmatpush3.bf16.msra.mxu0 %v185_v13  ;;  %v197_v32 = vpack.c.bf16 %v30_v29, %v29_v28  ;;  %v199_v33 = vpack.c.bf16 %v48_v31, %v47_v30  ;;  %v32_v35 = vld [vmem:[%s339_s1 + $0x58] sm:$0xff]  ;;  %v49_v36 = vld [vmem:[%s339_s1 + $0xe0] sm:$0xff]  ;;  %v50_v37 = vld [vmem:[%s339_s1 + $0xe8] sm:$0xff] }
   0xa   :  { %188 = vmatprep.subr.bf16.mxu0 %v187_v14  ;;  %v201_v38 = vpack.c.bf16 %v32_v35, %v31_v34  ;;  %v203_v39 = vpack.c.bf16 %v50_v37, %v49_v36  ;;  %v33_v40 = vld [vmem:[%s339_s1 + $0x60] sm:$0xff]  ;;  %v34_v41 = vld [vmem:[%s339_s1 + $0x68] sm:$0xff]  ;;  %v51_v42 = vld [vmem:[%s339_s1 + $0xf0] sm:$0xff] }
   0xb   :  { %v52_v43 = vld [vmem:[%s339_s1 + $0xf8] sm:$0xff]  ;;  %v205_v44 = vpack.c.bf16 %v34_v41, %v33_v40  ;;  %v35_v46 = vld [vmem:[%s339_s1 + $0x70] sm:$0xff]  ;;  %v19_v49 = vld [vmem:[%s340_s0] sm:$0xff] }
   0xc   :  { %v207_v45 = vpack.c.bf16 %v52_v43, %v51_v42  ;;  %v36_v47 = vld [vmem:[%s339_s1 + $0x78] sm:$0xff]  ;;  %v143_v52 = vld [vmem:[%s341_s2] ss:$0 sm:$0xff] }
   0xd   :  { %190 = vmatpush3.bf16.msra.mxu0 %v189_v19  ;;  %v209_v48 = vpack.c.bf16 %v36_v47, %v35_v46 }
   0xe   :  { %192 = vmatprep.subr.bf16.mxu0 %v191_v20 }
  0x11   :  { %194 = vmatpush3.bf16.msra.mxu0 %v193_v26 }
  0x12   :  { %196 = vmatprep.subr.bf16.mxu0 %v195_v27 }
  0x15   :  { %198 = vmatpush3.bf16.msra.mxu0 %v197_v32 }
  0x16   :  { %200 = vmatprep.subr.bf16.mxu0 %v199_v33 }
  0x19   :  { %202 = vmatpush3.bf16.msra.mxu0 %v201_v38 }
  0x1a   :  { %204 = vmatprep.subr.bf16.mxu0 %v203_v39 }
  0x1d   :  { %206 = vmatpush3.bf16.msra.mxu0 %v205_v44 }
  0x1e   :  { %208 = vmatprep.subr.bf16.mxu0 %v207_v45 }
  0x21   :  { %210 = vmatpush3.bf16.msra.mxu0 %v209_v48 }
  0x24   :  { %119 = vmatmul.mubr.f32.vlgmr.msra.gmra.mrb[0].mxu0 %v19_v49 }
  0xf7   :  { %v176_v50 = vpop.f32.mrb[0].mxu0 }
  0xf8   :  { %v177_v51 = vpop.f32.mrb[1].mxu0 }
  0xf9   :  { %v178_v53 = vadd.f32 %v177_v51, %v176_v50 }
  0xfb   :  { %v137_v54 = vadd.f32 %v178_v53, %v143_v52 }
  0xfd   :  { %138 = vst [vmem:[%s342_s3] sm:$0xff] %v137_v54 }

</bundles_post_ra>
